<compile_context>
chip_gen: v7x
topology: tpu7x:2x2x1
jax: 0.10.0
libtpu: 0.0.40
codegen_flags: <defaults>
</compile_context>

<pallas_src>
import functools

import jax
import jax.numpy as jnp
from jax import lax
from jax.experimental import pallas as pl
from jax.experimental.pallas import tpu as pltpu

HIDDEN = 8          # first Linear output width (from module __init__)
LANE_CHUNK = 1024   # in-kernel chunk of batch rows (= output lanes) per matmul block
MAX_CHUNKS = 32     # bound on the static unroll inside the kernel


def _round_up(a: int, b: int) -> int:
    return ((a + b - 1) // b) * b


def _round_down(a: int, b: int) -> int:
    return (a // b) * b


def _vmem_capacity_bytes() -> int:
    """Per-core VMEM capacity; conservative 64 MiB fallback (true on v7x, safe on all)."""
    default = 64 * 1024 * 1024
    try:
        info = pltpu.get_tpu_info()
        cap = int(getattr(info, "vmem_capacity_bytes", default))
        return cap if cap > 0 else default
    except Exception:
        return default


def _predict_kernel(x_ref, w1t_ref, b1_ref, w2_ref, b2_ref, o_ref, *, cs, num_chunks):
    # Parameters are tiny and resident; load once per grid step.
    w1t = w1t_ref[...]     # (8, D)
    b1 = b1_ref[...]       # (8, 1)
    w2 = w2_ref[...]       # (8, 1)
    b2 = b2_ref[...]       # (1, 1)

    # Static unroll over 1024-lane chunks of the batch tile: each chunk's (8, cs) f32
    # hidden value is only a few vregs and dies at its store, keeping vreg pressure
    # bounded even for multi-MiB x tiles.  All slice offsets are compile-time constants
    # and tile-aligned (cs % 8 == 0 on sublanes; lane offsets are multiples of cs).
    for c in range(num_chunks):
        lo = c * cs
        xc = x_ref[lo:lo + cs, :]                                     # (cs, D)

        # First Linear on the MXU: h[k, m] = sum_d w1t[k, d] * xc[m, d] -> (8, cs).
        # Batch stays on the lane axis so the epilogue and the output store are
        # lane-dense.  (Per review: if a lowering dump ever shows Mosaic pushing the
        # big x chunk as transposed MXU weights / inserting an XLU transpose, switch
        # to xc @ w1 + a lane reduce; measured slack today is 2-3x so the HBM stream
        # stays the binding unit either way.)
        h = lax.dot_general(
            w1t, xc,
            dimension_numbers=(((1,), (1,)), ((), ())),
            preferred_element_type=jnp.float32,
        )
        h = jnp.maximum(h + b1, 0.0)          # bias broadcast over lanes + ReLU
        # Dropout(p=0) is the identity -> omitted.
        # Second Linear(8 -> 1): VPU broadcast-multiply + sublane (XLU) reduce; a
        # K=8, N=1 MXU matmul would only add MXU round-trip latency.
        out = jnp.sum(h * w2, axis=0, keepdims=True) + b2             # (1, cs)
        o_ref[:, lo:lo + cs] = out.astype(o_ref.dtype)                # lane-dense store


def predict_layer(x, w1, b1, w2, b2, *, tm=None, target_tile_bytes=4 * 1024 * 1024):
    """Fused MLP forward: (N, D) -> (N, 1).

    x  : (N, D) float32
    w1 : (D, 8), b1 : (1, 8) (or (8,))
    w2 : (8, 1), b2 : (1, 1) (or scalar)
    tm : optional upper bound on the row tile (rows per grid step); default is sized
         automatically from target_tile_bytes (~4 MiB of x per grid step).
    """
    n, d = x.shape
    bytes_per_row = d * 4  # f32 stream

    # Lane-dense parameter layouts (one-time, wrapper-side transposes).
    w1_t = jnp.asarray(w1).T.reshape(HIDDEN, d)     # (8, D): 8 sublanes, D lanes
    b1_c = jnp.asarray(b1).reshape(HIDDEN, 1)       # (8, 1): broadcast over lanes
    w2_c = jnp.asarray(w2).reshape(HIDDEN, 1)       # (8, 1)
    b2_c = jnp.asarray(b2).reshape(1, 1)            # (1, 1)

    # --- Row-tile selection (kernel is HBM-streaming bound) -------------------------
    # 1) Target ~4 MiB of x per grid step so DMA time >> per-step pipeline overhead.
    tm_eff = max(8, _round_down(target_tile_bytes // bytes_per_row, 8))
    tm_eff = min(tm_eff, MAX_CHUNKS * LANE_CHUNK)          # bound in-kernel unroll
    # 2) Generation-aware VMEM safety clamp (double-buffered x tile <= ~60% of VMEM).
    vmem_cap = _vmem_capacity_bytes()
    tm_vmem = max(8, _round_down(int(vmem_cap * 0.6) // (2 * bytes_per_row), 8))
    tm_eff = min(tm_eff, tm_vmem)
    # 3) Never larger than the (8-aligned) batch.
    tm_eff = min(tm_eff, _round_up(n, 8))
    # 4) Optional user cap (e.g. to force a multi-step grid in tests).
    if tm is not None:
        tm_eff = min(tm_eff, max(8, _round_up(int(tm), 8)))
    # 5) v7x megacore: keep >= ~4 grid steps for the parallel axis, but only while each
    #    tile still moves >= ~1 MiB (no point shredding small inputs).
    min_useful_tm = max(8, _round_down((1 << 20) // bytes_per_row, 8))
    tm_quarter = _round_up(pl.cdiv(n, 4), 8)
    if tm_quarter >= min_useful_tm:
        tm_eff = min(tm_eff, tm_quarter)
    # 6) Align to the in-kernel lane chunk so static chunk slices tile the block.
    if tm_eff >= LANE_CHUNK:
        tm_eff = _round_down(tm_eff, LANE_CHUNK)
        cs = LANE_CHUNK
    else:
        tm_eff = max(8, _round_up(tm_eff, 8))
        cs = tm_eff
    num_chunks = tm_eff // cs

    n_tiles = pl.cdiv(n, tm_eff)   # partial last block handled by Pallas (no jnp.pad)

    kernel = functools.partial(_predict_kernel, cs=cs, num_chunks=num_chunks)

    out = pl.pallas_call(
        kernel,
        out_shape=jax.ShapeDtypeStruct((n_tiles, tm_eff), x.dtype),
        grid=(n_tiles,),
        in_specs=[
            # x: tile of rows (sublanes), full embedding dim on lanes (streamed).
            pl.BlockSpec((tm_eff, d), lambda i: (i, 0)),
            # Parameters: fully resident, constant index_map (DMA'd once, tiny).
            pl.BlockSpec((HIDDEN, d), lambda i: (0, 0)),
            pl.BlockSpec((HIDDEN, 1), lambda i: (0, 0)),
            pl.BlockSpec((HIDDEN, 1), lambda i: (0, 0)),
            pl.BlockSpec((1, 1), lambda i: (0, 0)),
        ],
        # Lane-dense output: one (1, TM) row per grid step -> unmasked stores.
        out_specs=pl.BlockSpec((1, tm_eff), lambda i: (i, 0)),
        compiler_params=pltpu.CompilerParams(
            dimension_semantics=("parallel",),           # shards across v7x's 2 TCs
            vmem_limit_bytes=int(vmem_cap * 0.85),       # ~54 MiB v7x, ~109 MiB v5e/v6e
        ),
    )(x, w1_t, b1_c, w2_c, b2_c)

    # (n_tiles, tm) row-major == batch order; drop the padded/garbage tail columns.
    return out.reshape(-1)[:n].reshape(n, 1)


def init_params(key, embedding_dim):
    """Deterministic init mimicking PyTorch Linear default (U(-1/sqrt(fan_in), +))."""
    k1, k2, k3, k4 = jax.random.split(key, 4)
    bound1 = 1.0 / jnp.sqrt(embedding_dim)
    bound2 = 1.0 / jnp.sqrt(HIDDEN)
    w1 = jax.random.uniform(k1, (embedding_dim, HIDDEN), jnp.float32, -bound1, bound1)
    b1 = jax.random.uniform(k2, (1, HIDDEN), jnp.float32, -bound1, bound1)
    w2 = jax.random.uniform(k3, (HIDDEN, 1), jnp.float32, -bound2, bound2)
    b2 = jax.random.uniform(k4, (1, 1), jnp.float32, -bound2, bound2)
    return w1, b1, w2, b2


def _reference(x, w1, b1, w2, b2):
    h = jnp.maximum(jnp.dot(x, w1, precision=lax.Precision.HIGHEST) + b1, 0.0)
    return jnp.dot(h, w2, precision=lax.Precision.HIGHEST) + b2


if __name__ == "__main__":
    key = jax.random.PRNGKey(0)
    kx, kp, kx2, kx3 = jax.random.split(key, 4)

    # Small base case.
    batch, embedding_dim = 16, 32
    x = jax.random.normal(kx, (batch, embedding_dim), jnp.float32)
    w1, b1, w2, b2 = init_params(kp, embedding_dim)
    out = jax.block_until_ready(predict_layer(x, w1, b1, w2, b2))
    ref = _reference(x, w1, b1, w2, b2)
    assert out.shape == (batch, 1)
    assert jnp.allclose(out, ref, atol=1e-4, rtol=1e-4), "mismatch vs reference (small)"

    # Non-divisible batch + multi-step grid (exercises the partial last x block that
    # replaced the wrapper jnp.pad, and lane-dense stores).
    batch2, d2 = 300, 128
    x2 = jax.random.normal(kx2, (batch2, d2), jnp.float32)
    p2 = init_params(jax.random.PRNGKey(1), d2)
    out2 = jax.block_until_ready(predict_layer(x2, *p2, tm=128))
    ref2 = _reference(x2, *p2)
    assert out2.shape == (batch2, 1)
    assert jnp.allclose(out2, ref2, atol=1e-4, rtol=1e-4), "mismatch vs reference (tail)"

    # Larger tile exercising the in-kernel multi-chunk epilogue (tm=2048, two 1024-lane
    # chunks, single grid step).
    batch3, d3 = 2048, 64
    x3 = jax.random.normal(kx3, (batch3, d3), jnp.float32)
    p3 = init_params(jax.random.PRNGKey(2), d3)
    out3 = jax.block_until_ready(predict_layer(x3, *p3))
    ref3 = _reference(x3, *p3)
    assert out3.shape == (batch3, 1)
    assert jnp.allclose(out3, ref3, atol=1e-4, rtol=1e-4), "mismatch vs reference (chunked)"

    print("KERNEL_OK")
</pallas_src>

<mosaic_0001>
module attributes {stable_mosaic.version = 11 : i64} {
  func.func @_predict_kernel(%arg0: i32, %arg1: memref<16x32xf32, #tpu.memory_space<vmem>>, %arg2: memref<8x32xf32, #tpu.memory_space<vmem>>, %arg3: memref<8x1xf32, #tpu.memory_space<vmem>>, %arg4: memref<8x1xf32, #tpu.memory_space<vmem>>, %arg5: memref<1x1xf32, #tpu.memory_space<vmem>>, %arg6: memref<1x16xf32, #tpu.memory_space<vmem>>) attributes {dimension_semantics = [#tpu.dimension_semantics<parallel>], iteration_bounds = array<i64: 1>, scalar_prefetch = 0 : i64, scratch_operands = 0 : i64, tpu.core_type = #tpu.core_type<tc>, window_params = [{transform_indices = @transform_0, window_bounds = array<i64: 16, 32>}, {pipeline_mode = #tpu.pipeline_mode<synchronous>, transform_indices = @transform_1, window_bounds = array<i64: 8, 32>}, {pipeline_mode = #tpu.pipeline_mode<synchronous>, transform_indices = @transform_2, window_bounds = array<i64: 8, 1>}, {pipeline_mode = #tpu.pipeline_mode<synchronous>, transform_indices = @transform_3, window_bounds = array<i64: 8, 1>}, {pipeline_mode = #tpu.pipeline_mode<synchronous>, transform_indices = @transform_4, window_bounds = array<i64: 1, 1>}, {transform_indices = @transform_5, window_bounds = array<i64: 1, 16>}]} {
    %c0 = arith.constant 0 : index
    %c0_0 = arith.constant 0 : index
    %0 = vector.load %arg2[%c0, %c0_0] : memref<8x32xf32, #tpu.memory_space<vmem>>, vector<8x32xf32>
    %c0_1 = arith.constant 0 : index
    %c0_2 = arith.constant 0 : index
    %1 = vector.load %arg3[%c0_1, %c0_2] : memref<8x1xf32, #tpu.memory_space<vmem>>, vector<8x1xf32>
    %c0_3 = arith.constant 0 : index
    %c0_4 = arith.constant 0 : index
    %2 = vector.load %arg4[%c0_3, %c0_4] : memref<8x1xf32, #tpu.memory_space<vmem>>, vector<8x1xf32>
    %c0_5 = arith.constant 0 : index
    %c0_6 = arith.constant 0 : index
    %3 = vector.load %arg5[%c0_5, %c0_6] : memref<1x1xf32, #tpu.memory_space<vmem>>, vector<1x1xf32>
    %c0_7 = arith.constant 0 : index
    %c0_8 = arith.constant 0 : index
    %4 = vector.load %arg1[%c0_7, %c0_8] : memref<16x32xf32, #tpu.memory_space<vmem>>, vector<16x32xf32>
    %cst = arith.constant dense<0.000000e+00> : vector<8x16xf32>
    %5 = tpu.matmul %0, %4, %cst {dimension_numbers = #tpu.dot_dimension_numbers<[1], [1], [0], [0], [0, 0, 1, 0], [], []>} : vector<8x32xf32>, vector<16x32xf32>, vector<8x16xf32> -> vector<8x16xf32>
    %6 = vector.broadcast %1 : vector<8x1xf32> to vector<8x16xf32>
    %7 = arith.addf %5, %6 : vector<8x16xf32>
    %cst_9 = arith.constant 0.000000e+00 : f32
    %8 = vector.broadcast %cst_9 : f32 to vector<8x16xf32>
    %9 = arith.maximumf %7, %8 : vector<8x16xf32>
    %10 = vector.broadcast %2 : vector<8x1xf32> to vector<8x16xf32>
    %11 = arith.mulf %9, %10 : vector<8x16xf32>
    %cst_10 = arith.constant dense<0.000000e+00> : vector<16xf32>
    %12 = vector.multi_reduction <add>, %11, %cst_10 [0] : vector<8x16xf32> to vector<16xf32>
    %13 = vector.shape_cast %12 : vector<16xf32> to vector<1x16xf32>
    %14 = vector.broadcast %3 : vector<1x1xf32> to vector<1x16xf32>
    %15 = arith.addf %13, %14 : vector<1x16xf32>
    %c0_11 = arith.constant 0 : index
    %c0_12 = arith.constant 0 : index
    %16 = vector.load %arg6[%c0_11, %c0_12] : memref<1x16xf32, #tpu.memory_space<vmem>>, vector<1x16xf32>
    tpu.vector_store %arg6[%c0_11, %c0_12], %15 {strides = array<i32>} : memref<1x16xf32, #tpu.memory_space<vmem>>, vector<1x16xf32>,
    return
  }
  func.func @transform_0(%arg0: i32) -> (i32, i32) {
    %c0_i32 = arith.constant 0 : i32
    %c0_i32_0 = arith.constant 0 : i32
    return %arg0, %c0_i32 : i32, i32
  }
  func.func @transform_1(%arg0: i32) -> (i32, i32) {
    %c0_i32 = arith.constant 0 : i32
    %c0_i32_0 = arith.constant 0 : i32
    %c0_i32_1 = arith.constant 0 : i32
    return %c0_i32, %c0_i32_0 : i32, i32
  }
  func.func @transform_2(%arg0: i32) -> (i32, i32) {
    %c0_i32 = arith.constant 0 : i32
    %c0_i32_0 = arith.constant 0 : i32
    %c0_i32_1 = arith.constant 0 : i32
    return %c0_i32, %c0_i32_0 : i32, i32
  }
  func.func @transform_3(%arg0: i32) -> (i32, i32) {
    %c0_i32 = arith.constant 0 : i32
    %c0_i32_0 = arith.constant 0 : i32
    %c0_i32_1 = arith.constant 0 : i32
    return %c0_i32, %c0_i32_0 : i32, i32
  }
  func.func @transform_4(%arg0: i32) -> (i32, i32) {
    %c0_i32 = arith.constant 0 : i32
    %c0_i32_0 = arith.constant 0 : i32
    %c0_i32_1 = arith.constant 0 : i32
    return %c0_i32, %c0_i32_0 : i32, i32
  }
  func.func @transform_5(%arg0: i32) -> (i32, i32) {
    %c0_i32 = arith.constant 0 : i32
    %c0_i32_0 = arith.constant 0 : i32
    return %arg0, %c0_i32 : i32, i32
  }
}

</mosaic_0001>

<bundles_post_ra>
// kernel: tpu_custom_call.1
= control target key start
LH: loop header
LB: loop body
LE: loop exit
PB: predicated region body
PF: predicated region fallthrough
CT: control target
= control target key end

     0   :  { %s271_s0 = inlined_call_operand.vmem [shape: f32[16,32], index: 0, kind: input, shape index: {}]   ;;  %s272_s1 = inlined_call_operand.vmem [shape: f32[8,32], index: 1, kind: input, shape index: {}]   ;;  %s273_s2 = inlined_call_operand.vmem [shape: f32[8,1], index: 2, kind: input, shape index: {}]   ;;  %s274_s3 = inlined_call_operand.vmem [shape: f32[8,1], index: 3, kind: input, shape index: {}]   ;;  %s275_s4 = inlined_call_operand.<no memory space> [shape: f32[1,1], index: 4, kind: input, shape index: {}]   ;;  %s276_s5 = inlined_call_operand.hbm [shape: f32[1,16], index: 5, kind: output, shape index: {}]  }
   0x1   :  { %v10_v0 = vstv %s275_s4 }
   0x2   :  { %11 = vst [vmem:[#allocation2] sm:$0x1] %v10_v0 }
   0x3   :  { %v27_v1 = vld [vmem:[%s271_s0] sm:$0xff]  ;;  %v28_v2 = vld [vmem:[%s271_s0 + $0x8] sm:$0xff]  ;;  %vm34_vm0 = vcmask 261120   ;;  %v203_v3 = vmov 0.0|0.0   ;;  %vm204_vm2 = vmmov 0   ;;  %v205_v5 = vmov 0.0  }
   0x4   :  { %168 = vmatprep.subr.bf16.mxu0 %v203_v3  ;;  %v169_v4 = vpack.c.bf16 %v28_v2, %v27_v1  ;;  %vm170_vm1 = vmpackc.low %vm34_vm0, %vm34_vm0  ;;  %165 = vmatprep.mubr.msk.f32.mxu0 %vm204_vm2, %v205_v5  ;;  %v24_v6 = vld [vmem:[%s273_s2] sm:$0xff]  ;;  %v206_v7 = vmov 0  }
   0x5   :  { %177 = vset.pattern.permute.xlu0 %v206_v7  ;;  %178 = vset.pattern.permute.xlu1 %v206_v7 }
   0x9   :  { %v26_v8 = vld [vmem:[#allocation2] sm:$0x1] }
   0xa   :  { %12 = vsyncpa [#allocation4], 0  ;;  %171 = vmatpush3.bf16.xpose.msk.msra.mxu0 %vm170_vm1, %v169_v4  ;;  %31 = vperm.xlu0 %177, %v24_v6   ;;  %v25_v9 = vld [vmem:[%s274_s3] sm:$0xff]  ;;  %vm121_vm3 = vcmask 130048   ;;  %v134_v17 = vlaneseq  ;;  %vm139_vm4 = vcmask 122880  }
   0xb   :  { %131 = vperm.xlu1 %178, %v26_v8   ;;  %v23_v10 = vld [vmem:[%s272_s1] sm:$0xff]  ;;  %s207_s1 = smov [#allocation3]  }
   0xc   :  { %v135_v21 = vshrl.u32 %v134_v17, 7  ;;  %s147_s2 = sshll.u32 %s207_s1, 4  ;;  %s148_s2 = int_to_ptr.vmem [resolvable:$true] %s147_s2 }
   0xd   :  { %s179_s3 = scalar_lea.vmem %s148_s2, 16  ;;  %s183_s28 = scalar_lea.vmem %s148_s2, 32 }
   0xe   :  { %117 = vperm.xlu0 %177, %v25_v9   ;;  %v136_v24 = vsub.s32 0, %v135_v21  ;;  %p180_p0 = scmp.ne.s32.totalorder %s148_s2, %s179_s3  ;;  %p184_p1 = scmp.lt.s32.totalorder %s148_s2, %s148_s2 }
   0xf   :  { %p185_p2 = scmp.lt.s32.totalorder %s183_s28, %s179_s3 }
  0x11   :  { %166 = vmatmul.mubr.msk.f32.vlgmr.msra.gmra.mrb[0].mxu0 %vm34_vm0, %v23_v10  ;;  %p186_p3 = por %p185_p2, %p184_p1 }
  0x13   :  { %p187_p4 = pnand %p186_p3, %p180_p0 }
  0x89   :  { %v32_v11 = vpop.permute.xlu0 %31 }
  0x8a   :  { %v132_v25 = vpop.permute.xlu1 %131 }
  0x8b   :  { %v137_v28 = vrot.slane %v132_v25, %v136_v24 }
  0x8d   :  { %v118_v16 = vpop.permute.xlu0 %117 }
  0xe4   :  { %v110_v12 = vpop.f32.mrb[0].mxu0 }
  0xe5   :  { %v111_v13 = vadd.f32 %v110_v12, %v32_v11  ;;  %v167_v14 = vpop.f32.mrb[1].mxu0 }
  0xe7   :  { %v114_v15 = vmax.f32 %v111_v13, 0.0 }
  0xe9   :  { %v120_v18 = vmul.f32 %v118_v16, %v114_v15 }
  0xeb   :  { %v122_v19 = vsel %vm121_vm3, %v120_v18, 0.0 }
  0xec   :  { %v123_v20 = vrot.slane %v122_v19, 4 }
  0xee   :  { %v124_v22 = vadd.f32 %v123_v20, %v122_v19 }
  0xf0   :  { %v125_v23 = vrot.slane %v124_v22, 2 }
  0xf2   :  { %v126_v26 = vadd.f32 %v125_v23, %v124_v22 }
  0xf4   :  { %v127_v27 = vrot.slane %v126_v26, 1 }
  0xf6   :  { %v128_v29 = vadd.f32 %v127_v27, %v126_v26 }
  0xf8   :  { %v138_v30 = vadd.f32 %v137_v28, %v128_v29 }
  0xfa   :  { %140 = vst.msk [vmem:[#allocation3] sm:$0x1] %vm139_vm4, %v138_v30 }
  0xfb   :  { %190 = shalt.err (!%p187_p4)
}
  0xfc   :  { %s191_s6 = scalar_lea.hbm %s276_s5, 16 }
  0xfd   :  { %p192_p5 = scmp.ne.s32.totalorder %s276_s5, %s191_s6  ;;  %p195_p6 = scmp.lt.u32.totalorder %s191_s6, %s276_s5 }
  0xff   :  { %p197_p7 = pnand %p195_p6, %p192_p5 }
 0x101   :  { %200 = shalt.err (!%p197_p7)
}
 0x102   :  { %150 = dma.vmem_to_hbm [thread:$0]  %s148_s2, 16, %s276_s5, [#allocation4]  }
 0x103   :  { %201 = dma.done.wait [#allocation4], 16  }
 0x104   :  { %202 = vsyncadd [#allocation4], 4294967280 }
 0x105   :  { %154 = vsyncpa [#allocation4], 1 }

</bundles_post_ra>
